<compile_context>
chip_gen: v7x
topology: tpu7x:2x2x1
jax: 0.10.0
libtpu: 0.0.40
codegen_flags: <defaults>
</compile_context>

<pallas_src>
import numpy as np
import jax
import jax.numpy as jnp
from jax.experimental import pallas as pl
from jax.experimental.pallas import tpu as pltpu


def _pick_block_rows(B, L, itemsize, max_rows=1024, vmem_budget_bytes=8 * 1024 * 1024):
    """Rows per block: as large as possible, bounded so 2 inputs x 2 pipeline
    buffers of (TB, L) stay well under the VMEM budget (v7x-safe)."""
    bytes_per_row = 4 * L * itemsize            # 2 inputs x 2 pipeline buffers
    cap = min(max_rows, max(8, vmem_budget_bytes // max(bytes_per_row, 1)))
    cap = max(8, (cap // 8) * 8)                # sublane multiple
    return B if B <= cap else cap


def _make_kploss_kernel(B, K, TB, position_loss_weight, needs_row_mask):
    L = 3 * K
    inv_pos = 1.0 / float(B * K * 2)            # torch MSELoss: mean over all elements
    inv_vis = 1.0 / float(B)                    # torch CrossEntropyLoss: mean over batch
    w = float(position_loss_weight)

    def kernel(pred_ref, targ_ref, visflag_ref, out_ref):
        # (TB, 3K) block of the fused [B, 3K] view; f32 accumulation (bf16 ok in HBM).
        p = pred_ref[...].astype(jnp.float32)
        t = targ_ref[...].astype(jnp.float32)

        vf = visflag_ref[...]                   # (1, L) f32: 1.0 on visibility lanes
        is_vis = vf > 0.5                       # lane masks, broadcast over rows
        is_pos = vf < 0.5

        if needs_row_mask:
            # Mask out-of-range rows of the last (partial) block.
            row0 = pl.program_id(0) * TB
            rows = row0 + jax.lax.broadcasted_iota(jnp.int32, (TB, L), 0)
            row_ok = rows < B
            pos_mask = jnp.logical_and(row_ok, is_pos)
            vis_mask = jnp.logical_and(row_ok, is_vis)
        else:
            pos_mask = jnp.logical_and(is_pos, jnp.full((TB, L), True))
            vis_mask = jnp.logical_and(is_vis, jnp.full((TB, L), True))

        # ---- position loss partial: sum of squared diffs on the x/y lanes ----
        d = p - t
        pos_sum = jnp.sum(jnp.where(pos_mask, d * d, 0.0))

        # ---- visibility loss partial: soft-label CE over the K visibility lanes ----
        logits = jnp.where(vis_mask, p, -jnp.inf)                # fill for masked max
        m = jnp.max(logits, axis=-1, keepdims=True)              # (TB, 1)
        e = jnp.exp(jnp.where(vis_mask, p - m, -jnp.inf))        # exp(-inf)=0 on masked lanes
        lse = m + jnp.log(jnp.sum(e, axis=-1, keepdims=True))    # (TB, 1)
        ce_sum = -jnp.sum(jnp.where(vis_mask, t * (p - lse), 0.0))

        # Pre-scaled partials (reciprocal constants, no divides in the hot path).
        pos_part = pos_sum * inv_pos
        vis_part = ce_sum * inv_vis
        tot_part = w * pos_part + (1.0 - w) * vis_part

        # Pack the three scalars into lanes 0..2 of this block's (1, 8, 128) tile.
        lane = jax.lax.broadcasted_iota(jnp.int32, (1, 8, 128), 2)
        tile = (jnp.where(lane == 0, pos_part, 0.0)
                + jnp.where(lane == 1, vis_part, 0.0)
                + jnp.where(lane == 2, tot_part, 0.0))
        out_ref[...] = tile

    return kernel


def kp_loss(pred, target, position_loss_weight=0.7, *, block_rows=None):
    """Pallas implementation of KpLoss.forward.

    pred, target: [B, K, 3] float32 or bfloat16 arrays.
    Returns (dfl_loss, {'pos_loss': ..., 'vis_loss': ...}) with scalar f32 values.
    """
    assert pred.shape == target.shape
    B, K, C = pred.shape
    assert C == 3
    L = 3 * K

    # Free contiguous views: [B, K, 3] -> [B, 3K]; channel split happens in-kernel.
    pred2d = pred.reshape(B, L)
    targ2d = target.reshape(B, L)

    itemsize = jnp.dtype(pred.dtype).itemsize
    if block_rows is None:
        TB = _pick_block_rows(B, L, itemsize)
    else:
        TB = int(block_rows)
        if TB < B:
            assert TB % 8 == 0, "block_rows must be a multiple of 8"
        else:
            TB = B
    num_blocks = int(pl.cdiv(B, TB))
    needs_row_mask = (B % TB) != 0

    # Tiny (1, 3K) lane-pattern input: 1.0 on visibility lanes, 0.0 on x/y lanes.
    # Same block index every grid step -> stays resident in VMEM, no re-DMA.
    vis_flag = jnp.asarray(
        np.tile(np.array([0.0, 0.0, 1.0], dtype=np.float32), K)
    ).reshape(1, L)

    kernel = _make_kploss_kernel(B, K, TB, position_loss_weight, needs_row_mask)

    partial_tiles = pl.pallas_call(
        kernel,
        grid=(num_blocks,),
        in_specs=[
            pl.BlockSpec((TB, L), lambda i: (i, 0)),   # pred block
            pl.BlockSpec((TB, L), lambda i: (i, 0)),   # target block
            pl.BlockSpec((1, L), lambda i: (0, 0)),    # lane pattern (resident)
        ],
        # Disjoint per-block partial tiles -> the axis can be split across the
        # two v7x TensorCores; combined by a tiny wrapper-side sum.
        out_specs=pl.BlockSpec((1, 8, 128), lambda i: (i, 0, 0)),
        out_shape=jax.ShapeDtypeStruct((num_blocks, 8, 128), jnp.float32),
        compiler_params=pltpu.CompilerParams(dimension_semantics=("parallel",)),
    )(pred2d, targ2d, vis_flag)

    if num_blocks == 1:
        sums = partial_tiles[0, 0, :3]
    else:
        sums = jnp.sum(partial_tiles[:, 0, :3], axis=0)  # combine per-core/block partials
    pos_loss = sums[0]
    vis_loss = sums[1]
    total = sums[2]
    return total, {'pos_loss': pos_loss, 'vis_loss': vis_loss}


def _reference_kp_loss(pred, target, position_loss_weight=0.7):
    # Pure-JAX reference mirroring torch MSELoss + CrossEntropyLoss (soft targets).
    pos_loss = jnp.mean((pred[:, :, :2] - target[:, :, :2]) ** 2)
    log_softmax = jax.nn.log_softmax(pred[:, :, 2], axis=-1)
    vis_loss = jnp.mean(-jnp.sum(target[:, :, 2] * log_softmax, axis=-1))
    total = position_loss_weight * pos_loss + (1 - position_loss_weight) * vis_loss
    return total, pos_loss, vis_loss


def _make_inputs(key, B, K, dtype=jnp.float32):
    k1, k2, k3 = jax.random.split(key, 3)
    pred = jax.random.normal(k1, (B, K, 3), dtype=jnp.float32)
    target_pos = jax.random.normal(k2, (B, K, 2), dtype=jnp.float32)
    target_vis = jax.random.bernoulli(k3, 0.5, (B, K, 1)).astype(jnp.float32)
    target = jnp.concatenate([target_pos, target_vis], axis=-1)
    return pred.astype(dtype), target.astype(dtype)


if __name__ == "__main__":
    # 1) Small shape consistent with the module: batch=2, 8 keypoints, 3 channels.
    pred, target = _make_inputs(jax.random.PRNGKey(0), B=2, K=8)
    total, parts = kp_loss(pred, target, position_loss_weight=0.7)
    jax.block_until_ready((total, parts))
    ref_total, ref_pos, ref_vis = _reference_kp_loss(pred, target, 0.7)
    assert jnp.allclose(total, ref_total, atol=1e-5)
    assert jnp.allclose(parts['pos_loss'], ref_pos, atol=1e-5)
    assert jnp.allclose(parts['vis_loss'], ref_vis, atol=1e-5)

    # 2) Multi-block / masked-tail path (grid > 1, parallel over batch blocks).
    pred2, target2 = _make_inputs(jax.random.PRNGKey(1), B=20, K=8)
    total2, parts2 = kp_loss(pred2, target2, 0.7, block_rows=8)
    jax.block_until_ready((total2, parts2))
    rt2, rp2, rv2 = _reference_kp_loss(pred2, target2, 0.7)
    assert jnp.allclose(total2, rt2, atol=1e-5)
    assert jnp.allclose(parts2['pos_loss'], rp2, atol=1e-5)
    assert jnp.allclose(parts2['vis_loss'], rv2, atol=1e-5)

    # 3) bf16 inputs (halves HBM bytes); f32 accumulation inside the kernel.
    pred_bf = pred2.astype(jnp.bfloat16)
    target_bf = target2.astype(jnp.bfloat16)
    total3, parts3 = kp_loss(pred_bf, target_bf, 0.7)
    jax.block_until_ready((total3, parts3))
    rt3, rp3, rv3 = _reference_kp_loss(pred_bf.astype(jnp.float32),
                                       target_bf.astype(jnp.float32), 0.7)
    assert jnp.allclose(total3, rt3, atol=1e-3)
    assert jnp.allclose(parts3['pos_loss'], rp3, atol=1e-3)
    assert jnp.allclose(parts3['vis_loss'], rv3, atol=1e-3)

    print("KERNEL_OK")
</pallas_src>

<mosaic_0001>
module attributes {stable_mosaic.version = 11 : i64} {
  func.func @kernel(%arg0: i32, %arg1: memref<2x24xf32, #tpu.memory_space<vmem>>, %arg2: memref<2x24xf32, #tpu.memory_space<vmem>>, %arg3: memref<1x24xf32, #tpu.memory_space<vmem>>, %arg4: memref<1x8x128xf32, #tpu.memory_space<vmem>>) attributes {dimension_semantics = [#tpu.dimension_semantics<parallel>], iteration_bounds = array<i64: 1>, scalar_prefetch = 0 : i64, scratch_operands = 0 : i64, tpu.core_type = #tpu.core_type<tc>, window_params = [{transform_indices = @transform_0, window_bounds = array<i64: 2, 24>}, {transform_indices = @transform_1, window_bounds = array<i64: 2, 24>}, {pipeline_mode = #tpu.pipeline_mode<synchronous>, transform_indices = @transform_2, window_bounds = array<i64: 1, 24>}, {transform_indices = @transform_3, window_bounds = array<i64: 1, 8, 128>}]} {
    %c0 = arith.constant 0 : index
    %c0_0 = arith.constant 0 : index
    %0 = vector.load %arg1[%c0, %c0_0] : memref<2x24xf32, #tpu.memory_space<vmem>>, vector<2x24xf32>
    %c0_1 = arith.constant 0 : index
    %c0_2 = arith.constant 0 : index
    %1 = vector.load %arg2[%c0_1, %c0_2] : memref<2x24xf32, #tpu.memory_space<vmem>>, vector<2x24xf32>
    %c0_3 = arith.constant 0 : index
    %c0_4 = arith.constant 0 : index
    %2 = vector.load %arg3[%c0_3, %c0_4] : memref<1x24xf32, #tpu.memory_space<vmem>>, vector<1x24xf32>
    %cst = arith.constant 5.000000e-01 : f32
    %3 = vector.broadcast %cst : f32 to vector<1x24xf32>
    %4 = arith.cmpf ogt, %2, %3 : vector<1x24xf32>
    %cst_5 = arith.constant 5.000000e-01 : f32
    %5 = vector.broadcast %cst_5 : f32 to vector<1x24xf32>
    %6 = arith.cmpf olt, %2, %5 : vector<1x24xf32>
    %true = arith.constant true
    %7 = vector.broadcast %true : i1 to vector<2x24xi1>
    %8 = vector.broadcast %6 : vector<1x24xi1> to vector<2x24xi1>
    %9 = arith.andi %8, %7 : vector<2x24xi1>
    %true_6 = arith.constant true
    %10 = vector.broadcast %true_6 : i1 to vector<2x24xi1>
    %11 = vector.broadcast %4 : vector<1x24xi1> to vector<2x24xi1>
    %12 = arith.andi %11, %10 : vector<2x24xi1>
    %13 = arith.subf %0, %1 : vector<2x24xf32>
    %14 = arith.mulf %13, %13 : vector<2x24xf32>
    %cst_7 = arith.constant 0.000000e+00 : f32
    %15 = vector.broadcast %cst_7 : f32 to vector<2x24xf32>
    %16 = arith.select %9, %14, %15 : vector<2x24xi1>, vector<2x24xf32>
    %17 = vector.shape_cast %16 : vector<2x24xf32> to vector<1x2x24xf32>
    %cst_8 = arith.constant dense<0.000000e+00> : vector<1xf32>
    %18 = vector.multi_reduction <add>, %17, %cst_8 [1, 2] : vector<1x2x24xf32> to vector<1xf32>
    %19 = vector.shape_cast %18 : vector<1xf32> to vector<1x1x1xf32>
    %20 = vector.extract %19[0, 0, 0] : f32 from vector<1x1x1xf32>
    %cst_9 = arith.constant 0xFF800000 : f32
    %21 = vector.broadcast %cst_9 : f32 to vector<2x24xf32>
    %22 = arith.select %12, %0, %21 : vector<2x24xi1>, vector<2x24xf32>
    %cst_10 = arith.constant dense<0xFF800000> : vector<2xf32>
    %23 = vector.multi_reduction <maximumf>, %22, %cst_10 [1] : vector<2x24xf32> to vector<2xf32>
    %24 = vector.shape_cast %23 : vector<2xf32> to vector<2x1xf32>
    %25 = vector.broadcast %24 : vector<2x1xf32> to vector<2x24xf32>
    %26 = arith.subf %0, %25 : vector<2x24xf32>
    %cst_11 = arith.constant 0xFF800000 : f32
    %27 = vector.broadcast %cst_11 : f32 to vector<2x24xf32>
    %28 = arith.select %12, %26, %27 : vector<2x24xi1>, vector<2x24xf32>
    %29 = math.exp %28 : vector<2x24xf32>
    %cst_12 = arith.constant dense<0.000000e+00> : vector<2xf32>
    %30 = vector.multi_reduction <add>, %29, %cst_12 [1] : vector<2x24xf32> to vector<2xf32>
    %31 = vector.shape_cast %30 : vector<2xf32> to vector<2x1xf32>
    %32 = math.log %31 : vector<2x1xf32>
    %33 = arith.addf %24, %32 : vector<2x1xf32>
    %34 = vector.broadcast %33 : vector<2x1xf32> to vector<2x24xf32>
    %35 = arith.subf %0, %34 : vector<2x24xf32>
    %36 = arith.mulf %1, %35 : vector<2x24xf32>
    %cst_13 = arith.constant 0.000000e+00 : f32
    %37 = vector.broadcast %cst_13 : f32 to vector<2x24xf32>
    %38 = arith.select %12, %36, %37 : vector<2x24xi1>, vector<2x24xf32>
    %39 = vector.shape_cast %38 : vector<2x24xf32> to vector<1x2x24xf32>
    %cst_14 = arith.constant dense<0.000000e+00> : vector<1xf32>
    %40 = vector.multi_reduction <add>, %39, %cst_14 [1, 2] : vector<1x2x24xf32> to vector<1xf32>
    %41 = vector.shape_cast %40 : vector<1xf32> to vector<1x1x1xf32>
    %42 = vector.extract %41[0, 0, 0] : f32 from vector<1x1x1xf32>
    %cst_15 = arith.constant 0.000000e+00 : f32
    %43 = arith.subf %cst_15, %42 : f32
    %cst_16 = arith.constant 3.125000e-02 : f32
    %44 = arith.mulf %20, %cst_16 : f32
    %cst_17 = arith.constant 5.000000e-01 : f32
    %45 = arith.mulf %43, %cst_17 : f32
    %cst_18 = arith.constant 0.699999988 : f32
    %46 = arith.mulf %cst_18, %44 : f32
    %cst_19 = arith.constant 3.000000e-01 : f32
    %47 = arith.mulf %cst_19, %45 : f32
    %48 = arith.addf %46, %47 : f32
    %49 = tpu.iota {dimensions = array<i32: 2>} : vector<1x8x128xi32>
    %c0_i32 = arith.constant 0 : i32
    %50 = vector.broadcast %c0_i32 : i32 to vector<1x8x128xi32>
    %51 = arith.cmpi eq, %49, %50 : vector<1x8x128xi32>
    %cst_20 = arith.constant 0.000000e+00 : f32
    %52 = vector.broadcast %44 : f32 to vector<1x8x128xf32>
    %53 = vector.broadcast %cst_20 : f32 to vector<1x8x128xf32>
    %54 = arith.select %51, %52, %53 : vector<1x8x128xi1>, vector<1x8x128xf32>
    %c1_i32 = arith.constant 1 : i32
    %55 = vector.broadcast %c1_i32 : i32 to vector<1x8x128xi32>
    %56 = arith.cmpi eq, %49, %55 : vector<1x8x128xi32>
    %cst_21 = arith.constant 0.000000e+00 : f32
    %57 = vector.broadcast %45 : f32 to vector<1x8x128xf32>
    %58 = vector.broadcast %cst_21 : f32 to vector<1x8x128xf32>
    %59 = arith.select %56, %57, %58 : vector<1x8x128xi1>, vector<1x8x128xf32>
    %60 = arith.addf %54, %59 : vector<1x8x128xf32>
    %c2_i32 = arith.constant 2 : i32
    %61 = vector.broadcast %c2_i32 : i32 to vector<1x8x128xi32>
    %62 = arith.cmpi eq, %49, %61 : vector<1x8x128xi32>
    %cst_22 = arith.constant 0.000000e+00 : f32
    %63 = vector.broadcast %48 : f32 to vector<1x8x128xf32>
    %64 = vector.broadcast %cst_22 : f32 to vector<1x8x128xf32>
    %65 = arith.select %62, %63, %64 : vector<1x8x128xi1>, vector<1x8x128xf32>
    %66 = arith.addf %60, %65 : vector<1x8x128xf32>
    %c0_23 = arith.constant 0 : index
    %c0_24 = arith.constant 0 : index
    %c0_25 = arith.constant 0 : index
    %67 = vector.load %arg4[%c0_23, %c0_24, %c0_25] : memref<1x8x128xf32, #tpu.memory_space<vmem>>, vector<1x8x128xf32>
    tpu.vector_store %arg4[%c0_23, %c0_24, %c0_25], %66 {strides = array<i32>} : memref<1x8x128xf32, #tpu.memory_space<vmem>>, vector<1x8x128xf32>,
    return
  }
  func.func @transform_0(%arg0: i32) -> (i32, i32) {
    %c0_i32 = arith.constant 0 : i32
    %c0_i32_0 = arith.constant 0 : i32
    return %arg0, %c0_i32 : i32, i32
  }
  func.func @transform_1(%arg0: i32) -> (i32, i32) {
    %c0_i32 = arith.constant 0 : i32
    %c0_i32_0 = arith.constant 0 : i32
    return %arg0, %c0_i32 : i32, i32
  }
  func.func @transform_2(%arg0: i32) -> (i32, i32) {
    %c0_i32 = arith.constant 0 : i32
    %c0_i32_0 = arith.constant 0 : i32
    %c0_i32_1 = arith.constant 0 : i32
    return %c0_i32, %c0_i32_0 : i32, i32
  }
  func.func @transform_3(%arg0: i32) -> (i32, i32, i32) {
    %c0_i32 = arith.constant 0 : i32
    %c0_i32_0 = arith.constant 0 : i32
    %c0_i32_1 = arith.constant 0 : i32
    return %arg0, %c0_i32, %c0_i32_0 : i32, i32, i32
  }
}

</mosaic_0001>

<bundles_post_ra>
// kernel: tpu_custom_call.1
= control target key start
LH: loop header
LB: loop body
LE: loop exit
PB: predicated region body
PF: predicated region fallthrough
CT: control target
= control target key end

     0   :  { %8 = vsyncpa [#allocation3], 0  ;;  %s239_s0 = inlined_call_operand.hbm [shape: f32[2,24], index: 0, kind: input, shape index: {}]   ;;  %s240_s1 = inlined_call_operand.vmem [shape: f32[2,24], index: 1, kind: input, shape index: {}]   ;;  %s241_s2 = inlined_call_operand.vmem [shape: f32[1,24], index: 2, kind: input, shape index: {}]   ;;  %s242_s3 = inlined_call_operand.hbm [shape: f32[1,8,128], index: 3, kind: output, shape index: {}]  }
   0x1   :  { %9 = vsyncpa [#allocation4], 0  ;;  %s179_s12 = smov [#allocation2]   ;;  %s131_s16 = scalar_lea.hbm %s239_s0, 32 }
   0x2   :  { %s16_s13 = sshll.u32 %s179_s12, 4  ;;  %p132_p0 = scmp.ne.s32.totalorder %s239_s0, %s131_s16  ;;  %s17_s13 = int_to_ptr.vmem [resolvable:$true] %s16_s13 }
   0x3   :  { %p135_p1 = scmp.lt.u32.totalorder %s131_s16, %s239_s0 }
   0x5   :  { %p137_p2 = pnand %p135_p1, %p132_p0 }
   0x7   :  { %140 = shalt.err (!%p137_p2)
}
   0x8   :  { %s141_s21 = scalar_lea.vmem %s17_s13, 32  ;;  %p146_p4 = scmp.lt.s32.totalorder %s17_s13, %s17_s13 }
   0x9   :  { %p142_p3 = scmp.ne.s32.totalorder %s17_s13, %s141_s21  ;;  %p147_p5 = scmp.lt.s32.totalorder %s141_s21, %s141_s21 }
   0xb   :  { %p148_p6 = por %p147_p5, %p146_p4 }
   0xd   :  { %p149_p7 = pnand %p148_p6, %p142_p3 }
   0xf   :  { %152 = shalt.err (!%p149_p7)
}
  0x10   :  { %19 = dma.hbm_to_vmem [thread:$0]  %s239_s0, 32, %s17_s13, [#allocation3]  }
  0x11   :  { %175 = dma.done.wait [#allocation3], 32  }
  0x12   :  { %176 = vsyncadd [#allocation3], 4294967264  ;;  %v33_v0 = vlaneseq  ;;  %v29_v3 = vld [vmem:[%s241_s2] sm:$0x1]  ;;  %v180_v4 = vmov 0   ;;  %vm47_vm1 = vcmask 189440  }
  0x13   :  { %vm30_vm0 = vcmp.gt.f32.partialorder %v29_v3, 0.5  ;;  %v27_v6 = vld [vmem:[#allocation2] sm:$0x3]  ;;  %vm31_vm3 = vcmp.lt.f32.partialorder %v29_v3, 0.5  ;;  %s181_s6 = smov [#allocation5]  }
  0x14   :  { %v34_v1 = vshrl.u32 %v33_v0, 7  ;;  %v38_v5 = vsel %vm30_vm0, 1, %v180_v4  ;;  %v28_v16 = vld [vmem:[%s240_s1] sm:$0x3]  ;;  %v32_v17 = vsel %vm31_vm3, 1, %v180_v4  ;;  %v92_v45 = vand.u32 127, %v33_v0 }
  0x15   :  { %v44_v18 = vsub.f32 %v27_v6, %v28_v16  ;;  %s111_s7 = sshll.u32 %s181_s6, 4  ;;  %s112_s7 = int_to_ptr.vmem [resolvable:$true] %s111_s7 }
  0x16   :  { %v35_v2 = vsub.s32 0, %v34_v1  ;;  %vm96_vm5 = vcmp.eq.s32.totalorder %v92_v45, 1  ;;  %vm93_vm6 = vcmp.eq.s32.totalorder %v92_v45, 0  ;;  %vm100_vm7 = vcmp.eq.s32.totalorder %v92_v45, 2  ;;  %s153_s8 = scalar_lea.vmem %s112_s7, 128  ;;  %p158_p9 = scmp.lt.s32.totalorder %s112_s7, %s112_s7 }
  0x17   :  { %v45_v20 = vmul.f32 %v44_v18, %v44_v18  ;;  %p154_p8 = scmp.ne.s32.totalorder %s112_s7, %s153_s8  ;;  %p159_p10 = scmp.lt.s32.totalorder %s153_s8, %s153_s8 }
  0x18   :  { %v42_v7 = vrot.slane %v38_v5, %v35_v2  ;;  %v36_v19 = vrot.slane %v32_v17, %v35_v2 }
  0x19   :  { %p160_p11 = por %p159_p10, %p158_p9 }
  0x1a   :  { %vm43_vm2 = vcmp.eq.s32.totalorder %v42_v7, 1  ;;  %vm37_vm4 = vcmp.eq.s32.totalorder %v36_v19, 1 }
  0x1b   :  { %v58_v8 = vsel %vm43_vm2, %v27_v6, -inf  ;;  %v46_v21 = vsel %vm37_vm4, %v45_v20, 0.0  ;;  %p161_p12 = pnand %p160_p11, %p154_p8 }
  0x1c   :  { %v59_v9 = vsel %vm47_vm1, %v58_v8, -inf  ;;  %v48_v22 = vsel %vm47_vm1, %v46_v21, 0.0 }
  0x1d   :  { %60 = vmax.xlane.f32.xlu0 %v59_v9  ;;  %49 = vadd.xlane.f32.xlu1 %v48_v22 }
  0xaa   :  { %v61_v10 = vpop.xlane.xlu0 %60  ;;  %v50_v31 = vpop.xlane.xlu1 %49 }
  0xab   :  { %v62_v11 = vsub.f32 %v27_v6, %v61_v10  ;;  %v51_v32 = vrot.slane %v50_v31, 4 }
  0xad   :  { %v63_v12 = vsel %vm43_vm2, %v62_v11, -inf  ;;  %v52_v33 = vadd.f32 %v51_v32, %v50_v31 }
  0xae   :  { %v64_v13 = vmul.f32 1.442695, %v63_v12 }
  0xaf   :  { %v53_v34 = vrot.slane %v52_v33, 2 }
  0xb0   :  { %127 = vpow2.f32 %v64_v13 }
  0xb1   :  { %v54_v35 = vadd.f32 %v53_v34, %v52_v33 }
  0xb3   :  { %v55_v36 = vrot.slane %v54_v35, 1 }
  0xb5   :  { %v56_v37 = vadd.f32 %v55_v36, %v54_v35 }
  0xb7   :  { %120 = vpush %v56_v37 }
  0xba   :  { %v128_v14 = vpop.eup %127 }
  0xbb   :  { %v66_v15 = vsel %vm47_vm1, %v128_v14, 0.0 }
  0xbc   :  { %67 = vadd.xlane.f32.xlu0 %v66_v15 }
  0xe8   :  { %s121_s1 = spop %120 }
  0xe9   :  { %s86_s26 = smul.f32 0.03125, %s121_s1 }
  0xeb   :  { %s88_s30 = smul.f32 0.7, %s86_s26  ;;  %v94_v46 = vstv %s86_s26 }
  0xec   :  { %v95_v49 = vsel %vm93_vm6, %v94_v46, 0.0 }
 0x149   :  { %v68_v23 = vpop.xlane.xlu0 %67 }
 0x14a   :  { %129 = vlog2.f32 %v68_v23 }
 0x154   :  { %v130_v24 = vpop.eup %129 }
 0x155   :  { %v70_v25 = vmul.f32 0.6931472, %v130_v24 }
 0x157   :  { %v71_v26 = vadd.f32 %v70_v25, %v61_v10 }
 0x159   :  { %v72_v27 = vsub.f32 %v27_v6, %v71_v26 }
 0x15b   :  { %v73_v28 = vmul.f32 %v72_v27, %v28_v16 }
 0x15d   :  { %v74_v29 = vsel %vm43_vm2, %v73_v28, 0.0 }
 0x15e   :  { %v75_v30 = vsel %vm47_vm1, %v74_v29, 0.0 }
 0x15f   :  { %76 = vadd.xlane.f32.xlu1 %v75_v30 }
 0x1ec   :  { %v77_v38 = vpop.xlane.xlu1 %76 }
 0x1ed   :  { %v78_v39 = vrot.slane %v77_v38, 4 }
 0x1ef   :  { %v79_v40 = vadd.f32 %v78_v39, %v77_v38 }
 0x1f1   :  { %v80_v41 = vrot.slane %v79_v40, 2 }
 0x1f3   :  { %v81_v42 = vadd.f32 %v80_v41, %v79_v40 }
 0x1f5   :  { %v82_v43 = vrot.slane %v81_v42, 1 }
 0x1f7   :  { %v83_v44 = vadd.f32 %v82_v43, %v81_v42 }
 0x1f9   :  { %122 = vpush %v83_v44 }
 0x22a   :  { %s123_s27 = spop %122 }
 0x22b   :  { %s85_s28 = ssub.f32 0.0, %s123_s27 }
 0x22d   :  { %s87_s29 = smul.f32 0.5, %s85_s28 }
 0x22f   :  { %s89_s4 = smul.f32 0.3, %s87_s29  ;;  %v97_v47 = vstv %s87_s29 }
 0x230   :  { %v98_v48 = vsel %vm96_vm5, %v97_v47, 0.0 }
 0x231   :  { %s90_s5 = sadd.f32 %s89_s4, %s88_s30  ;;  %v99_v50 = vadd.f32 %v98_v48, %v95_v49 }
 0x233   :  { %v101_v51 = vstv %s90_s5 }
 0x234   :  { %v102_v52 = vsel %vm100_vm7, %v101_v51, 0.0 }
 0x235   :  { %v103_v53 = vadd.f32 %v102_v52, %v99_v50 }
 0x237   :  { %104 = vst [vmem:[#allocation5] sm:$0xff] %v103_v53 }
 0x238   :  { %164 = shalt.err (!%p161_p12)
}
 0x239   :  { %s165_s11 = scalar_lea.hbm %s242_s3, 128 }
 0x23a   :  { %p166_p13 = scmp.ne.s32.totalorder %s242_s3, %s165_s11  ;;  %p169_p0 = scmp.lt.u32.totalorder %s165_s11, %s242_s3 }
 0x23c   :  { %p171_p1 = pnand %p169_p0, %p166_p13 }
 0x23e   :  { %174 = shalt.err (!%p171_p1)
}
 0x23f   :  { %114 = dma.vmem_to_hbm [thread:$0]  %s112_s7, 128, %s242_s3, [#allocation4]  }
 0x240   :  { %177 = dma.done.wait [#allocation4], 128  }
 0x241   :  { %178 = vsyncadd [#allocation4], 4294967168 }
 0x242   :  { %118 = vsyncpa [#allocation3], 1 }
 0x243   :  { %119 = vsyncpa [#allocation4], 1 }

</bundles_post_ra>
